<compile_context>
chip_gen: v7x
topology: tpu7x:2x2x1
jax: 0.10.0
libtpu: 0.0.40
codegen_flags: <defaults>
</compile_context>

<pallas_src>
import math

import jax
import jax.numpy as jnp
from jax.experimental import pallas as pl
from jax.experimental.pallas import tpu as pltpu

LANE = 128     # TPU lane width: last dims padded to multiples of this
SUBLANE = 8    # f32 sublane height: batch padded to multiples of this


def _round_up(n, m):
    return ((n + m - 1) // m) * m


def _pad_to(a, axis, target):
    pad = target - a.shape[axis]
    if pad == 0:
        return a
    widths = [(0, 0)] * a.ndim
    widths[axis] = (0, pad)
    return jnp.pad(a, widths)


def prepare_params(w_in, w_rec, b, tau, *, mxu_dtype=jnp.float32):
    """Pad parameters to lane-aligned shapes, cast matmul operands, fold 1/tau.

    In a real module this is computed once and cached (hoisted out of steps).
    """
    input_size, hidden = w_in.shape
    ip = _round_up(input_size, LANE)
    hp = _round_up(hidden, LANE)
    w_in_p = _pad_to(_pad_to(w_in, 1, hp), 0, ip).astype(mxu_dtype)
    w_rec_p = _pad_to(_pad_to(w_rec, 1, hp), 0, hp).astype(mxu_dtype)
    b_p = _pad_to(b.astype(jnp.float32), 0, hp)
    inv_tau_p = _pad_to((1.0 / tau).astype(jnp.float32), 0, hp)  # pad AFTER inverting
    bt = jnp.stack([b_p, inv_tau_p], axis=0)                     # (2, hp) f32
    return w_in_p, w_rec_p, bt


# ---------------------------------------------------------------------------
# Single-step kernel — exactly the PyTorch module's forward(x, h).
#   Two accumulating MXU dots (no activation concat), f32 accumulation,
#   f32 elementwise update; whole problem resident in VMEM (no grid).
# ---------------------------------------------------------------------------
def ltc_cell_kernel(x_ref, h_ref, w_in_ref, w_rec_ref, bt_ref, o_ref):
    h = h_ref[...]                                    # f32 carry
    mxu_dtype = w_in_ref.dtype
    pre = (
        jnp.dot(x_ref[...], w_in_ref[...], preferred_element_type=jnp.float32)
        + jnp.dot(h.astype(mxu_dtype), w_rec_ref[...],
                  preferred_element_type=jnp.float32)
        + bt_ref[0:1, :]                              # bias broadcasts over batch
    )
    s = jnp.tanh(pre)
    o_ref[...] = (h + (s - h) * bt_ref[1:2, :]).astype(o_ref.dtype)


def ltc_cell_forward(x, h, w_in, w_rec, b, tau, *, mxu_dtype=jnp.float32):
    """One LTC step.  Hidden / feature axes are lane-padded in the wrapper."""
    batch, _ = x.shape
    hidden = h.shape[-1]
    bp = _round_up(batch, SUBLANE)

    w_in_p, w_rec_p, bt = prepare_params(w_in, w_rec, b, tau, mxu_dtype=mxu_dtype)
    ip, hp = w_in_p.shape

    x_p = _pad_to(_pad_to(x, 1, ip), 0, bp).astype(mxu_dtype)
    h_p = _pad_to(_pad_to(h, 1, hp), 0, bp).astype(jnp.float32)

    out = pl.pallas_call(
        ltc_cell_kernel,
        out_shape=jax.ShapeDtypeStruct((bp, hp), jnp.float32),
    )(x_p, h_p, w_in_p, w_rec_p, bt)
    return out[:batch, :hidden]


# ---------------------------------------------------------------------------
# Sequence kernel — grid = (batch_tiles, time_chunks).
# The output block is the carried hidden state (constant index map along the
# time axis => VMEM-resident across the whole recurrence, written to HBM once
# per batch tile).  Weights / [b;1/tau] use constant index maps (DMA'd once).
# Inside each grid step an unrolled fori_loop runs `time_chunk` timesteps.
# ---------------------------------------------------------------------------
def ltc_seq_kernel(x_ref, h0_ref, w_in_ref, w_rec_ref, bt_ref, o_ref):
    c = pl.program_id(1)                              # time-chunk index

    @pl.when(c == 0)
    def _init():
        o_ref[...] = h0_ref[...]

    # Hoisted out of the time loop: VMEM-resident weights and the (B, H)
    # broadcasts of b and 1/tau (JAX does not CSE broadcast_in_dim).
    w_in = w_in_ref[...]
    w_rec = w_rec_ref[...]
    mxu_dtype = w_in.dtype
    tile_shape = o_ref.shape
    b_bc = jnp.broadcast_to(bt_ref[0:1, :], tile_shape)
    inv_tau_bc = jnp.broadcast_to(bt_ref[1:2, :], tile_shape)

    def step(i, h):
        x_t = x_ref[i]                                # (B_tile, I_pad)
        pre = (
            jnp.dot(x_t, w_in, preferred_element_type=jnp.float32)
            + jnp.dot(h.astype(mxu_dtype), w_rec,
                      preferred_element_type=jnp.float32)
            + b_bc
        )
        s = jnp.tanh(pre)
        return h + (s - h) * inv_tau_bc               # f32 carry

    h = jax.lax.fori_loop(0, x_ref.shape[0], step, o_ref[...], unroll=True)
    o_ref[...] = h.astype(o_ref.dtype)


def ltc_sequence_forward(xs, h0, w_in, w_rec, b, tau, *,
                         time_chunk=None, batch_tile=None,
                         mxu_dtype=jnp.float32):
    """Apply the LTC cell over a (T, B, input_size) sequence in one kernel.

    Returns the final hidden state (B, hidden).
    """
    seq_len, batch, _ = xs.shape
    hidden = h0.shape[-1]

    w_in_p, w_rec_p, bt = prepare_params(w_in, w_rec, b, tau, mxu_dtype=mxu_dtype)
    ip, hp = w_in_p.shape

    bp = _round_up(batch, SUBLANE)
    if batch_tile is None:
        batch_tile = bp
    assert bp % batch_tile == 0 and batch_tile % SUBLANE == 0

    if time_chunk is None:
        time_chunk = seq_len
    assert seq_len % time_chunk == 0

    xs_p = _pad_to(_pad_to(xs, 2, ip), 1, bp).astype(mxu_dtype)
    h0_p = _pad_to(_pad_to(h0, 1, hp), 0, bp).astype(jnp.float32)

    grid = (bp // batch_tile, seq_len // time_chunk)

    return pl.pallas_call(
        ltc_seq_kernel,
        out_shape=jax.ShapeDtypeStruct((bp, hp), jnp.float32),
        grid_spec=pltpu.PrefetchScalarGridSpec(
            num_scalar_prefetch=0,
            grid=grid,
            in_specs=[
                # x chunk: only this streams per grid step.
                pl.BlockSpec((time_chunk, batch_tile, ip),
                             lambda bi, c: (c, bi, 0)),
                # h0: per batch tile, constant along time.
                pl.BlockSpec((batch_tile, hp), lambda bi, c: (bi, 0)),
                # Parameters: constant index maps -> VMEM resident.
                pl.BlockSpec((ip, hp), lambda bi, c: (0, 0)),
                pl.BlockSpec((hp, hp), lambda bi, c: (0, 0)),
                pl.BlockSpec((2, hp), lambda bi, c: (0, 0)),
            ],
            out_specs=pl.BlockSpec((batch_tile, hp), lambda bi, c: (bi, 0)),
        ),
        compiler_params=pltpu.CompilerParams(
            # batch tiles independent (uses v7x's 2nd TensorCore); time is a
            # sequential recurrence.
            dimension_semantics=("parallel", "arbitrary"),
            vmem_limit_bytes=32 * 1024 * 1024,
        ),
    )(xs_p, h0_p, w_in_p, w_rec_p, bt)[:batch, :hidden]


# ---------------------------------------------------------------------------
# Init matching the PyTorch module's reset_parameters(), and pure-JAX refs.
# ---------------------------------------------------------------------------
def init_params(key, input_size, hidden_size):
    """kaiming_uniform_(a=sqrt(5)) on a 2-D (rows, cols) tensor draws from
    U(-1/sqrt(fan_in), 1/sqrt(fan_in)) with fan_in = cols (torch convention)."""
    k_in, k_rec = jax.random.split(key)
    bound = 1.0 / math.sqrt(hidden_size)
    w_in = jax.random.uniform(
        k_in, (input_size, hidden_size), jnp.float32, -bound, bound)
    w_rec = jax.random.uniform(
        k_rec, (hidden_size, hidden_size), jnp.float32, -bound, bound)
    b = jnp.zeros((hidden_size,), jnp.float32)
    tau = jnp.ones((hidden_size,), jnp.float32)
    return w_in, w_rec, b, tau


def ltc_cell_reference(x, h, w_in, w_rec, b, tau, *,
                       mxu_dtype=jnp.float32, precision=None):
    md = mxu_dtype
    pre = (
        jnp.dot(x.astype(md), w_in.astype(md),
                preferred_element_type=jnp.float32, precision=precision)
        + jnp.dot(h.astype(md), w_rec.astype(md),
                  preferred_element_type=jnp.float32, precision=precision)
        + b
    )
    s = jnp.tanh(pre)
    return h + (s - h) / tau


def ltc_sequence_reference(xs, h0, w_in, w_rec, b, tau, *,
                           mxu_dtype=jnp.float32, precision=None):
    h = h0
    for t in range(xs.shape[0]):
        h = ltc_cell_reference(xs[t], h, w_in, w_rec, b, tau,
                               mxu_dtype=mxu_dtype, precision=precision)
    return h


if __name__ == "__main__":
    input_size = 16
    hidden_size = 32
    batch = 8
    seq_len = 8

    key = jax.random.PRNGKey(0)
    k_w, k_x, k_h, k_xs, k_b, k_tau = jax.random.split(key, 6)

    w_in, w_rec, b, tau = init_params(k_w, input_size, hidden_size)
    # Exercise the general (trained) path: arbitrary bias and positive tau.
    b = 0.1 * jax.random.normal(k_b, (hidden_size,), jnp.float32)
    tau = jax.random.uniform(k_tau, (hidden_size,), jnp.float32, 0.5, 2.0)

    x = jax.random.normal(k_x, (batch, input_size), jnp.float32)
    h = jax.random.normal(k_h, (batch, hidden_size), jnp.float32)
    xs = jax.random.normal(k_xs, (seq_len, batch, input_size), jnp.float32)

    highest = jax.lax.Precision.HIGHEST

    # --- single step, f32 MXU (the PyTorch module's forward) ----------------
    h_new = ltc_cell_forward(x, h, w_in, w_rec, b, tau)
    jax.block_until_ready(h_new)
    h_ref = ltc_cell_reference(x, h, w_in, w_rec, b, tau, precision=highest)
    assert h_new.shape == (batch, hidden_size)
    # Tolerances absorb MXU f32 pass-count differences between XLA and Mosaic
    # plus the 1/tau-multiply vs tau-divide rounding.
    assert jnp.allclose(h_new, h_ref, atol=5e-3, rtol=5e-3), \
        float(jnp.max(jnp.abs(h_new - h_ref)))

    # --- full recurrence, f32 MXU, chunked time axis (grid carries h) -------
    h_seq = ltc_sequence_forward(xs, h, w_in, w_rec, b, tau, time_chunk=4)
    jax.block_until_ready(h_seq)
    h_seq_ref = ltc_sequence_reference(xs, h, w_in, w_rec, b, tau,
                                       precision=highest)
    assert h_seq.shape == (batch, hidden_size)
    assert jnp.allclose(h_seq, h_seq_ref, atol=2e-2, rtol=2e-2), \
        float(jnp.max(jnp.abs(h_seq - h_seq_ref)))

    # --- full recurrence, bf16 MXU operands (v6e/v7x fast path), f32 carry --
    h_seq_bf = ltc_sequence_forward(xs, h, w_in, w_rec, b, tau,
                                    time_chunk=4, mxu_dtype=jnp.bfloat16)
    jax.block_until_ready(h_seq_bf)
    h_seq_ref_bf = ltc_sequence_reference(xs, h, w_in, w_rec, b, tau,
                                          mxu_dtype=jnp.bfloat16)
    assert h_seq_bf.shape == (batch, hidden_size)
    assert jnp.allclose(h_seq_bf, h_seq_ref_bf, atol=5e-3, rtol=5e-3), \
        float(jnp.max(jnp.abs(h_seq_bf - h_seq_ref_bf)))

    print("KERNEL_OK")
</pallas_src>

<mosaic_0001>
module attributes {stable_mosaic.version = 11 : i64} {
  func.func @ltc_cell_kernel(%arg0: memref<8x128xf32, #tpu.memory_space<vmem>>, %arg1: memref<8x128xf32, #tpu.memory_space<vmem>>, %arg2: memref<128x128xf32, #tpu.memory_space<vmem>>, %arg3: memref<128x128xf32, #tpu.memory_space<vmem>>, %arg4: memref<2x128xf32, #tpu.memory_space<vmem>>, %arg5: memref<8x128xf32, #tpu.memory_space<vmem>>) attributes {dimension_semantics = [], scalar_prefetch = 0 : i64, scratch_operands = 0 : i64, tpu.core_type = #tpu.core_type<tc>} {
    %c0 = arith.constant 0 : index
    %c0_0 = arith.constant 0 : index
    %0 = vector.load %arg1[%c0, %c0_0] : memref<8x128xf32, #tpu.memory_space<vmem>>, vector<8x128xf32>
    %c0_1 = arith.constant 0 : index
    %c0_2 = arith.constant 0 : index
    %1 = vector.load %arg0[%c0_1, %c0_2] : memref<8x128xf32, #tpu.memory_space<vmem>>, vector<8x128xf32>
    %c0_3 = arith.constant 0 : index
    %c0_4 = arith.constant 0 : index
    %2 = vector.load %arg2[%c0_3, %c0_4] : memref<128x128xf32, #tpu.memory_space<vmem>>, vector<128x128xf32>
    %cst = arith.constant dense<0.000000e+00> : vector<8x128xf32>
    %3 = tpu.matmul %1, %2, %cst {dimension_numbers = #tpu.dot_dimension_numbers<[1], [0], [0], [1], [0, 0, 1, 1], [], []>} : vector<8x128xf32>, vector<128x128xf32>, vector<8x128xf32> -> vector<8x128xf32>
    %c0_5 = arith.constant 0 : index
    %c0_6 = arith.constant 0 : index
    %4 = vector.load %arg3[%c0_5, %c0_6] : memref<128x128xf32, #tpu.memory_space<vmem>>, vector<128x128xf32>
    %cst_7 = arith.constant dense<0.000000e+00> : vector<8x128xf32>
    %5 = tpu.matmul %0, %4, %cst_7 {dimension_numbers = #tpu.dot_dimension_numbers<[1], [0], [0], [1], [0, 0, 1, 1], [], []>} : vector<8x128xf32>, vector<128x128xf32>, vector<8x128xf32> -> vector<8x128xf32>
    %6 = arith.addf %3, %5 : vector<8x128xf32>
    %c0_8 = arith.constant 0 : index
    %c0_9 = arith.constant 0 : index
    %7 = vector.load %arg4[%c0_8, %c0_9] : memref<2x128xf32, #tpu.memory_space<vmem>>, vector<1x128xf32>
    %8 = vector.broadcast %7 : vector<1x128xf32> to vector<8x128xf32>
    %9 = arith.addf %6, %8 : vector<8x128xf32>
    %10 = math.tanh %9 : vector<8x128xf32>
    %11 = arith.subf %10, %0 : vector<8x128xf32>
    %c1 = arith.constant 1 : index
    %c0_10 = arith.constant 0 : index
    %12 = vector.load %arg4[%c1, %c0_10] : memref<2x128xf32, #tpu.memory_space<vmem>>, vector<1x128xf32>
    %13 = vector.broadcast %12 : vector<1x128xf32> to vector<8x128xf32>
    %14 = arith.mulf %11, %13 : vector<8x128xf32>
    %15 = arith.addf %0, %14 : vector<8x128xf32>
    %c0_11 = arith.constant 0 : index
    %c0_12 = arith.constant 0 : index
    %16 = vector.load %arg5[%c0_11, %c0_12] : memref<8x128xf32, #tpu.memory_space<vmem>>, vector<8x128xf32>
    tpu.vector_store %arg5[%c0_11, %c0_12], %15 {strides = array<i32>} : memref<8x128xf32, #tpu.memory_space<vmem>>, vector<8x128xf32>,
    return
  }
}

</mosaic_0001>

<bundles_post_ra>
// kernel: tpu_custom_call.1
= control target key start
LH: loop header
LB: loop body
LE: loop exit
PB: predicated region body
PF: predicated region fallthrough
CT: control target
= control target key end

     0   :  { %10 = vsyncpa [#allocation3], 0  ;;  %s685_s0 = inlined_call_operand.hbm [shape: f32[8,128], index: 0, kind: input, shape index: {}]   ;;  %s686_s1 = inlined_call_operand.hbm [shape: f32[8,128], index: 1, kind: input, shape index: {}]   ;;  %s687_s2 = inlined_call_operand.hbm [shape: f32[128,128], index: 2, kind: input, shape index: {}]   ;;  %s688_s3 = inlined_call_operand.hbm [shape: f32[128,128], index: 3, kind: input, shape index: {}]   ;;  %s689_s4 = inlined_call_operand.vmem [shape: f32[2,128], index: 4, kind: input, shape index: {}]   ;;  %s690_s5 = inlined_call_operand.hbm [shape: f32[8,128], index: 5, kind: output, shape index: {}]  }
   0x1   :  { %11 = vsyncpa [#allocation6], 0 }
   0x2   :  { %12 = vsyncpa [#allocation9], 0 }
   0x3   :  { %13 = vsyncpa [#allocation4], 0  ;;  %s563_s18 = smov [#allocation5]   ;;  %s564_s20 = smov [#allocation2]  }
   0x4   :  { %s30_s19 = sshll.u32 %s563_s18, 4  ;;  %s20_s21 = sshll.u32 %s564_s20, 4  ;;  %s31_s19 = int_to_ptr.vmem [resolvable:$true] %s30_s19  ;;  %s21_s21 = int_to_ptr.vmem [resolvable:$true] %s20_s21 }
   0x5   :  { %s445_s24 = scalar_lea.hbm %s686_s1, 128 }
   0x6   :  { %p446_p0 = scmp.ne.s32.totalorder %s686_s1, %s445_s24  ;;  %p449_p1 = scmp.lt.u32.totalorder %s445_s24, %s686_s1 }
   0x8   :  { %p451_p2 = pnand %p449_p1, %p446_p0 }
   0xa   :  { %454 = shalt.err (!%p451_p2)
}
   0xb   :  { %s455_s29 = scalar_lea.vmem %s31_s19, 128  ;;  %p460_p4 = scmp.lt.s32.totalorder %s31_s19, %s31_s19 }
   0xc   :  { %p456_p3 = scmp.ne.s32.totalorder %s31_s19, %s455_s29  ;;  %p461_p5 = scmp.lt.s32.totalorder %s455_s29, %s455_s29 }
   0xe   :  { %p462_p6 = por %p461_p5, %p460_p4 }
  0x10   :  { %p463_p7 = pnand %p462_p6, %p456_p3 }
  0x12   :  { %466 = shalt.err (!%p463_p7)
}
  0x13   :  { %33 = dma.hbm_to_vmem [thread:$0]  %s686_s1, 128, %s31_s19, [#allocation6]  }
  0x14   :  { %s467_s9 = scalar_lea.hbm %s685_s0, 128 }
  0x15   :  { %p468_p8 = scmp.ne.s32.totalorder %s685_s0, %s467_s9  ;;  %p471_p9 = scmp.lt.u32.totalorder %s467_s9, %s685_s0 }
  0x17   :  { %p473_p10 = pnand %p471_p9, %p468_p8 }
  0x19   :  { %476 = shalt.err (!%p473_p10)
}
  0x1a   :  { %s477_s14 = scalar_lea.vmem %s21_s21, 128  ;;  %p482_p12 = scmp.lt.s32.totalorder %s21_s21, %s21_s21 }
  0x1b   :  { %p478_p11 = scmp.ne.s32.totalorder %s21_s21, %s477_s14  ;;  %p483_p13 = scmp.lt.s32.totalorder %s477_s14, %s477_s14 }
  0x1d   :  { %p484_p0 = por %p483_p13, %p482_p12 }
  0x1f   :  { %p485_p1 = pnand %p484_p0, %p478_p11 }
  0x21   :  { %488 = shalt.err (!%p485_p1)
}
  0x22   :  { %23 = dma.hbm_to_vmem [thread:$0]  %s685_s0, 128, %s21_s21, [#allocation3]  }
  0x23   :  { %s565_s16 = smov [#allocation7]   ;;  %s489_s20 = scalar_lea.hbm %s687_s2, 2048 }
  0x24   :  { %s39_s17 = sshll.u32 %s565_s16, 4  ;;  %p490_p2 = scmp.ne.s32.totalorder %s687_s2, %s489_s20  ;;  %s40_s17 = int_to_ptr.vmem [resolvable:$true] %s39_s17 }
  0x25   :  { %p493_p3 = scmp.lt.u32.totalorder %s489_s20, %s687_s2 }
  0x27   :  { %p495_p4 = pnand %p493_p3, %p490_p2 }
  0x29   :  { %498 = shalt.err (!%p495_p4)
}
  0x2a   :  { %s499_s26 = scalar_lea.vmem %s40_s17, 2048  ;;  %p504_p6 = scmp.lt.s32.totalorder %s40_s17, %s40_s17 }
  0x2b   :  { %p500_p5 = scmp.ne.s32.totalorder %s40_s17, %s499_s26  ;;  %p505_p7 = scmp.lt.s32.totalorder %s499_s26, %s499_s26 }
  0x2d   :  { %p506_p8 = por %p505_p7, %p504_p6 }
  0x2f   :  { %p507_p9 = pnand %p506_p8, %p500_p5 }
  0x31   :  { %510 = shalt.err (!%p507_p9)
}
  0x32   :  { %s566_s0 = smov 128   ;;  %s567_s21 = smov 8  }
  0x33   :  { %45 = dma.hbm_to_vmem [thread:$0]  %s687_s2, 2048, %s40_s17, [#allocation6], %s566_s0, %s566_s0, %s567_s21  }
  0x34   :  { %s568_s29 = smov [#allocation8]   ;;  %s511_s8 = scalar_lea.hbm %s688_s3, 2048 }
  0x35   :  { %s51_s30 = sshll.u32 %s568_s29, 4  ;;  %p512_p10 = scmp.ne.s32.totalorder %s688_s3, %s511_s8  ;;  %s52_s30 = int_to_ptr.vmem [resolvable:$true] %s51_s30 }
  0x36   :  { %p515_p11 = scmp.lt.u32.totalorder %s511_s8, %s688_s3 }
  0x38   :  { %p517_p12 = pnand %p515_p11, %p512_p10 }
  0x3a   :  { %520 = shalt.err (!%p517_p12)
}
  0x3b   :  { %s521_s13 = scalar_lea.vmem %s52_s30, 2048  ;;  %p526_p0 = scmp.lt.s32.totalorder %s52_s30, %s52_s30 }
  0x3c   :  { %p522_p13 = scmp.ne.s32.totalorder %s52_s30, %s521_s13  ;;  %p527_p1 = scmp.lt.s32.totalorder %s521_s13, %s521_s13 }
  0x3e   :  { %p528_p2 = por %p527_p1, %p526_p0 }
  0x40   :  { %p529_p3 = pnand %p528_p2, %p522_p13 }
  0x42   :  { %532 = shalt.err (!%p529_p3)
}
  0x43   :  { %57 = dma.hbm_to_vmem [thread:$0]  %s688_s3, 2048, %s52_s30, [#allocation9], %s566_s0, %s566_s0, %s567_s21  }
  0x44   :  { %555 = dma.done.wait [#allocation3], 128  }
  0x45   :  { %556 = vsyncadd [#allocation3], 4294967168 }
  0x46   :  { %557 = dma.done.wait [#allocation6], 2176  }
  0x47   :  { %558 = vsyncadd [#allocation6], 4294965120 }
  0x48   :  { %559 = dma.done.wait [#allocation9], 2048  }
  0x49   :  { %560 = vsyncadd [#allocation9], 4294965248  ;;  %v569_v0 = vmov 0.0|0.0   ;;  %vm570_vm0 = vmmov 0   ;;  %v571_v1 = vmov 0.0   ;;  %v90_v2 = vld [vmem:[#allocation8] sm:$0xff] }
  0x4a   :  { %385 = vmatprep.subr.bf16.mxu0 %v569_v0  ;;  %409 = vmatprep.subr.bf16.mxu1 %v569_v0  ;;  %v91_v3 = vld [vmem:[#allocation8 + $0x8] sm:$0xff]  ;;  %v74_v4 = vld [vmem:[#allocation7] sm:$0xff]  ;;  %v92_v7 = vld [vmem:[#allocation8 + $0x10] sm:$0xff]  ;;  %s572_s17 = smov [#allocation10]  }
  0x4b   :  { %347 = vmatprep.mubr.msk.f32.mxu0 %vm570_vm0, %v571_v1  ;;  %382 = vmatprep.mubr.msk.f32.mxu1 %vm570_vm0, %v571_v1  ;;  %v386_v5 = vpack.c.bf16 %v91_v3, %v90_v2  ;;  %v75_v6 = vld [vmem:[#allocation7 + $0x8] sm:$0xff]  ;;  %v93_v8 = vld [vmem:[#allocation8 + $0x18] sm:$0xff]  ;;  %v76_v10 = vld [vmem:[#allocation7 + $0x10] sm:$0xff]  ;;  %s268_s18 = sshll.u32 %s572_s17, 4  ;;  %s269_s18 = int_to_ptr.vmem [resolvable:$true] %s268_s18 }
  0x4c   :  { %v410_v9 = vpack.c.bf16 %v75_v6, %v74_v4  ;;  %v77_v11 = vld [vmem:[#allocation7 + $0x18] sm:$0xff]  ;;  %v389_v12 = vpack.c.bf16 %v93_v8, %v92_v7  ;;  %v94_v14 = vld [vmem:[#allocation8 + $0x20] sm:$0xff]  ;;  %v95_v15 = vld [vmem:[#allocation8 + $0x28] sm:$0xff]  ;;  %s533_s19 = scalar_lea.vmem %s269_s18, 128  ;;  %p538_p5 = scmp.lt.s32.totalorder %s269_s18, %s269_s18 }
  0x4d   :  { %387 = vmatpush3.bf16.msra.mxu0 %v386_v5  ;;  %v413_v13 = vpack.c.bf16 %v77_v11, %v76_v10  ;;  %v78_v16 = vld [vmem:[#allocation7 + $0x20] sm:$0xff]  ;;  %v79_v17 = vld [vmem:[#allocation7 + $0x28] sm:$0xff]  ;;  %v392_v18 = vpack.c.bf16 %v95_v15, %v94_v14  ;;  %v96_v20 = vld [vmem:[#allocation8 + $0x30] sm:$0xff]  ;;  %p534_p4 = scmp.ne.s32.totalorder %s269_s18, %s533_s19  ;;  %p539_p6 = scmp.lt.s32.totalorder %s533_s19, %s533_s19 }
  0x4e   :  { %411 = vmatpush3.bf16.msra.mxu1 %v410_v9  ;;  %388 = vmatprep.subr.bf16.mxu0 %v569_v0  ;;  %v416_v19 = vpack.c.bf16 %v79_v17, %v78_v16  ;;  %v97_v21 = vld [vmem:[#allocation8 + $0x38] sm:$0xff]  ;;  %v80_v22 = vld [vmem:[#allocation7 + $0x30] sm:$0xff]  ;;  %v98_v26 = vld [vmem:[#allocation8 + $0x40] sm:$0xff] }
  0x4f   :  { %412 = vmatprep.subr.bf16.mxu1 %v569_v0  ;;  %v81_v23 = vld [vmem:[#allocation7 + $0x38] sm:$0xff]  ;;  %v395_v24 = vpack.c.bf16 %v97_v21, %v96_v20  ;;  %v99_v27 = vld [vmem:[#allocation8 + $0x48] sm:$0xff]  ;;  %v82_v28 = vld [vmem:[#allocation7 + $0x40] sm:$0xff]  ;;  %p540_p7 = por %p539_p6, %p538_p5 }
  0x50   :  { %v419_v25 = vpack.c.bf16 %v81_v23, %v80_v22  ;;  %v83_v29 = vld [vmem:[#allocation7 + $0x48] sm:$0xff]  ;;  %v398_v30 = vpack.c.bf16 %v99_v27, %v98_v26  ;;  %v100_v32 = vld [vmem:[#allocation8 + $0x50] sm:$0xff]  ;;  %v101_v33 = vld [vmem:[#allocation8 + $0x58] sm:$0xff] }
  0x51   :  { %390 = vmatpush3.bf16.msra.mxu0 %v389_v12  ;;  %v422_v31 = vpack.c.bf16 %v83_v29, %v82_v28  ;;  %v84_v34 = vld [vmem:[#allocation7 + $0x50] sm:$0xff]  ;;  %v85_v35 = vld [vmem:[#allocation7 + $0x58] sm:$0xff]  ;;  %v401_v36 = vpack.c.bf16 %v101_v33, %v100_v32  ;;  %v102_v38 = vld [vmem:[#allocation8 + $0x60] sm:$0xff]  ;;  %p541_p8 = pnand %p540_p7, %p534_p4 }
  0x52   :  { %414 = vmatpush3.bf16.msra.mxu1 %v413_v13  ;;  %391 = vmatprep.subr.bf16.mxu0 %v569_v0  ;;  %v425_v37 = vpack.c.bf16 %v85_v35, %v84_v34  ;;  %v103_v39 = vld [vmem:[#allocation8 + $0x68] sm:$0xff]  ;;  %v86_v40 = vld [vmem:[#allocation7 + $0x60] sm:$0xff]  ;;  %v104_v44 = vld [vmem:[#allocation8 + $0x70] sm:$0xff] }
  0x53   :  { %415 = vmatprep.subr.bf16.mxu1 %v569_v0  ;;  %v87_v41 = vld [vmem:[#allocation7 + $0x68] sm:$0xff]  ;;  %v404_v42 = vpack.c.bf16 %v103_v39, %v102_v38  ;;  %v105_v45 = vld [vmem:[#allocation8 + $0x78] sm:$0xff]  ;;  %v88_v46 = vld [vmem:[#allocation7 + $0x70] sm:$0xff] }
  0x54   :  { %v428_v43 = vpack.c.bf16 %v87_v41, %v86_v40  ;;  %v89_v47 = vld [vmem:[#allocation7 + $0x78] sm:$0xff]  ;;  %v407_v48 = vpack.c.bf16 %v105_v45, %v104_v44  ;;  %v73_v51 = vld [vmem:[#allocation2] sm:$0xff] }
  0x55   :  { %393 = vmatpush3.bf16.msra.mxu0 %v392_v18  ;;  %v431_v49 = vpack.c.bf16 %v89_v47, %v88_v46  ;;  %v72_v50 = vld [vmem:[#allocation5] sm:$0xff]  ;;  %v279_v54 = vld [vmem:[%s689_s4] ss:$0 sm:$0xff]  ;;  %v280_v60 = vld [vmem:[%s689_s4 + $0x1] ss:$0 sm:$0xff] }
  0x56   :  { %417 = vmatpush3.bf16.msra.mxu1 %v416_v19  ;;  %394 = vmatprep.subr.bf16.mxu0 %v569_v0 }
  0x57   :  { %418 = vmatprep.subr.bf16.mxu1 %v569_v0 }
  0x59   :  { %396 = vmatpush3.bf16.msra.mxu0 %v395_v24 }
  0x5a   :  { %420 = vmatpush3.bf16.msra.mxu1 %v419_v25  ;;  %397 = vmatprep.subr.bf16.mxu0 %v569_v0 }
  0x5b   :  { %421 = vmatprep.subr.bf16.mxu1 %v569_v0 }
  0x5d   :  { %399 = vmatpush3.bf16.msra.mxu0 %v398_v30 }
  0x5e   :  { %423 = vmatpush3.bf16.msra.mxu1 %v422_v31  ;;  %400 = vmatprep.subr.bf16.mxu0 %v569_v0 }
  0x5f   :  { %424 = vmatprep.subr.bf16.mxu1 %v569_v0 }
  0x61   :  { %402 = vmatpush3.bf16.msra.mxu0 %v401_v36 }
  0x62   :  { %426 = vmatpush3.bf16.msra.mxu1 %v425_v37  ;;  %403 = vmatprep.subr.bf16.mxu0 %v569_v0 }
  0x63   :  { %427 = vmatprep.subr.bf16.mxu1 %v569_v0 }
  0x65   :  { %405 = vmatpush3.bf16.msra.mxu0 %v404_v42 }
  0x66   :  { %429 = vmatpush3.bf16.msra.mxu1 %v428_v43  ;;  %406 = vmatprep.subr.bf16.mxu0 %v569_v0 }
  0x67   :  { %430 = vmatprep.subr.bf16.mxu1 %v569_v0 }
  0x69   :  { %408 = vmatpush3.bf16.msra.mxu0 %v407_v48 }
  0x6a   :  { %432 = vmatpush3.bf16.msra.mxu1 %v431_v49 }
  0x6c   :  { %348 = vmatmul.mubr.f32.vlgmr.msra.gmra.mrb[0].mxu0 %v72_v50 }
  0x6d   :  { %383 = vmatmul.mubr.f32.vlgmr.msra.gmra.mrb[0].mxu1 %v73_v51 }
 0x13f   :  { %v172_v52 = vpop.f32.mrb[0].mxu0 }
 0x140   :  { %v242_v53 = vpop.f32.mrb[0].mxu1  ;;  %v349_v55 = vpop.f32.mrb[1].mxu0 }
 0x141   :  { %v243_v56 = vadd.f32 %v242_v53, %v172_v52  ;;  %v384_v57 = vpop.f32.mrb[1].mxu1 }
 0x143   :  { %v251_v58 = vadd.f32 %v279_v54, %v243_v56 }
 0x145   :  { %443 = vtanh.f32 %v251_v58 }
 0x14f   :  { %v444_v59 = vpop.eup %443 }
 0x150   :  { %v253_v61 = vsub.f32 %v444_v59, %v72_v50 }
 0x152   :  { %v259_v62 = vmul.f32 %v280_v60, %v253_v61 }
 0x154   :  { %v260_v63 = vadd.f32 %v259_v62, %v72_v50 }
 0x156   :  { %261 = vst [vmem:[#allocation10] sm:$0xff] %v260_v63 }
 0x157   :  { %544 = shalt.err (!%p541_p8)
}
 0x158   :  { %s545_s23 = scalar_lea.hbm %s690_s5, 128 }
 0x159   :  { %p546_p9 = scmp.ne.s32.totalorder %s690_s5, %s545_s23  ;;  %p549_p10 = scmp.lt.u32.totalorder %s545_s23, %s690_s5 }
 0x15b   :  { %p551_p11 = pnand %p549_p10, %p546_p9 }
 0x15d   :  { %554 = shalt.err (!%p551_p11)
}
 0x15e   :  { %271 = dma.vmem_to_hbm [thread:$0]  %s269_s18, 128, %s690_s5, [#allocation4]  }
 0x15f   :  { %561 = dma.done.wait [#allocation4], 128  }
 0x160   :  { %562 = vsyncadd [#allocation4], 4294967168 }
 0x161   :  { %275 = vsyncpa [#allocation3], 1 }
 0x162   :  { %276 = vsyncpa [#allocation6], 1 }
 0x163   :  { %277 = vsyncpa [#allocation9], 1 }
 0x164   :  { %278 = vsyncpa [#allocation4], 1 }

</bundles_post_ra>
